<compile_context>
chip_gen: v7x
topology: tpu7x:2x2x1
jax: 0.10.0
libtpu: 0.0.40
codegen_flags: <defaults>
</compile_context>

<pallas_src>
import functools

import jax
import jax.numpy as jnp
from jax import lax
from jax.experimental import pallas as pl
from jax.experimental.pallas import tpu as pltpu


def _mlp_head_kernel(x_ref, w_ref, b_ref, o_ref, *, bb, compute_bf16):
    # x_ref: (Bb, C, TN)    channels-first tiles of Bb batch elements
    # w_ref: (C, E_out)     projection weight (weight.T, possibly zero-padded)
    # b_ref: (1, E_out)     bias (possibly zero-padded)
    # o_ref: (Bb, TN, E_out)
    w = w_ref[...]
    if compute_bf16:
        w = w.astype(jnp.bfloat16)
    b = b_ref[...]
    for i in range(bb):  # bb is a small static int (1..8): unrolled
        x_cn = x_ref[i]                                   # (C, TN)
        if compute_bf16:
            x_cn = x_cn.astype(jnp.bfloat16)
        # Contract the channel axis (axis 0 of both operands) on the MXU;
        # the "transpose" is absorbed into the transposed-LHS matmul.
        y = lax.dot_general(
            x_cn, w,
            dimension_numbers=(((0,), (0,)), ((), ())),
            preferred_element_type=jnp.float32)           # (TN, E_out), f32 acc
        o_ref[i] = (y + b).astype(o_ref.dtype)            # bias add = VPU filler


def _vmem_budget_bytes():
    """~80% of physical VMEM (leaves headroom for Mosaic scratch / DMA)."""
    try:
        cap = int(pltpu.get_tpu_info().vmem_capacity_bytes)
    except Exception:
        cap = 64 * 1024 * 1024  # safe on every generation (v7x floor)
    return int(cap * 0.8)


def make_mlp_head(weight, bias, *, compute_bf16=False):
    """weight: (E, C) PyTorch layout, bias: (E,). Returns a jitted apply(x_nchw)."""
    E, C = weight.shape

    # --- one-time weight prep (hoisted out of the per-call path) -------------
    E_pad128 = ((E + 127) // 128) * 128
    if E % 128 == 0:
        E_out = E                      # already lane-dense
    elif E_pad128 <= int(E * 1.25):
        E_out = E_pad128               # small waste: pad for unmasked vst
    else:
        E_out = E                      # E << 128: write directly (masked vst)

    w_t = weight.T                                        # (C, E)
    b_p = bias
    if E_out != E:
        w_t = jnp.pad(w_t, ((0, 0), (0, E_out - E)))
        b_p = jnp.pad(bias, (0, E_out - E))
    b2d = b_p.reshape(1, E_out)
    w_t = jax.device_put(w_t)
    b2d = jax.device_put(b2d)

    def apply(x_nchw):
        B, C_in, H, W = x_nchw.shape
        assert C_in == C, f"channel mismatch: {C_in} vs {C}"
        N = H * W

        # Free, contiguous reshape (no HBM transpose).
        x_bcn = x_nchw.reshape(B, C, N)

        # Robustness for N not divisible by 128: zero-pad the seq axis.
        N_pad = ((N + 127) // 128) * 128
        if N_pad != N:
            x_bcn = jnp.pad(x_bcn, ((0, 0), (0, 0), (0, N_pad - N)))

        x_isz = jnp.dtype(x_bcn.dtype).itemsize
        o_isz = x_isz
        w_isz = jnp.dtype(w_t.dtype).itemsize
        budget = _vmem_budget_bytes()

        # Weight + bias are single-buffered (Buffered(1), constant index_map).
        resident = (C * E_out + E_out) * w_isz

        def footprint(bb, tn):
            # 2x for the pipelined x / out blocks, 1x for the resident weight.
            xo = bb * (C * tn * x_isz + tn * E_out * o_isz)
            return 2 * xo + resident

        # Candidate seq tiles: 128-multiples dividing N_pad, capped at 2048.
        cands = sorted(
            (t for t in range(128, min(N_pad, 2048) + 1, 128) if N_pad % t == 0),
            reverse=True)
        TN = cands[-1]  # 128 (or N_pad if N_pad < 128-step range — never happens)
        for t in cands:
            if int(footprint(1, t) * 1.2) <= budget:
                TN = t
                break

        # Guarantee >= 2 grid steps so both v7x TensorCores get work.
        def n_steps(bb, tn):
            return (B // bb) * (N_pad // tn)
        if n_steps(1, TN) < 2:
            for t in cands:
                if t < TN and n_steps(1, t) >= 2 and int(footprint(1, t) * 1.2) <= budget:
                    TN = t
                    break

        # Amortize the ~0.35 us/step overhead when per-step work is tiny by
        # blocking several batch elements per grid step.
        Bb = 1
        if 2 * C * TN * E_out < (1 << 22):
            for cand in (8, 4, 2):
                if (B % cand == 0 and n_steps(cand, TN) >= 2
                        and int(footprint(cand, TN) * 1.2) <= budget):
                    Bb = cand
                    break

        grid = (B // Bb, N_pad // TN)
        need = footprint(Bb, TN)
        vmem_limit = int(min(budget, max(int(need * 1.2), 16 * 1024 * 1024)))

        cost = pl.CostEstimate(
            flops=2 * B * N * C * E,                       # real (un-padded) work
            transcendentals=0,
            bytes_accessed=int(x_bcn.size * x_isz
                               + (C * E_out + E_out) * w_isz
                               + B * N_pad * E_out * o_isz))

        kernel = functools.partial(_mlp_head_kernel, bb=Bb,
                                   compute_bf16=compute_bf16)

        out = pl.pallas_call(
            kernel,
            out_shape=jax.ShapeDtypeStruct((B, N_pad, E_out), x_nchw.dtype),
            grid_spec=pltpu.PrefetchScalarGridSpec(
                num_scalar_prefetch=0,
                grid=grid,
                in_specs=[
                    pl.BlockSpec((Bb, C, TN), lambda b, n: (b, 0, n)),
                    # Constant across the grid -> single buffer (saves VMEM).
                    pl.BlockSpec((C, E_out), lambda b, n: (0, 0),
                                 pipeline_mode=pl.Buffered(1)),
                    pl.BlockSpec((1, E_out), lambda b, n: (0, 0),
                                 pipeline_mode=pl.Buffered(1)),
                ],
                out_specs=pl.BlockSpec((Bb, TN, E_out), lambda b, n: (b, n, 0)),
            ),
            compiler_params=pltpu.CompilerParams(
                dimension_semantics=("parallel", "parallel"),
                vmem_limit_bytes=vmem_limit),
            cost_estimate=cost,
        )(x_bcn, w_t, b2d)

        if N_pad != N:
            out = out[:, :N, :]
        if E_out != E:
            out = out[..., :E]
        return out

    return jax.jit(apply)


if __name__ == "__main__":
    # Small shapes consistent with the module: dim=C=32, embed_dim=E=16,
    # spatial 16x16 -> seq N=256, batch B=2.
    B, C, H, W = 2, 32, 16, 16
    E = 16

    key = jax.random.PRNGKey(0)
    kx, kw, kb = jax.random.split(key, 3)

    x = jax.random.normal(kx, (B, C, H, W), dtype=jnp.float32)

    # Deterministic init mimicking nn.Linear: U(-1/sqrt(dim), 1/sqrt(dim)).
    bound = 1.0 / (C ** 0.5)
    weight = jax.random.uniform(kw, (E, C), minval=-bound, maxval=bound,
                                dtype=jnp.float32)
    bias = jax.random.uniform(kb, (E,), minval=-bound, maxval=bound,
                              dtype=jnp.float32)

    mlp_head = make_mlp_head(weight, bias)        # weight prep happens once here
    out = mlp_head(x)
    out = jax.block_until_ready(out)

    # Reference check (plain JAX) for correctness vs the PyTorch semantics.
    x_bnc = jnp.transpose(x.reshape(B, C, H * W), (0, 2, 1))
    ref = x_bnc @ weight.T + bias
    assert out.shape == (B, H * W, E)
    assert jnp.allclose(out, ref, atol=1e-5, rtol=1e-5)

    print("KERNEL_OK")
</pallas_src>

<mosaic_0001>
module attributes {stable_mosaic.version = 11 : i64} {
  func.func @_mlp_head_kernel(%arg0: i32, %arg1: i32, %arg2: memref<1x32x256xf32, #tpu.memory_space<vmem>>, %arg3: memref<32x16xf32, #tpu.memory_space<vmem>>, %arg4: memref<1x16xf32, #tpu.memory_space<vmem>>, %arg5: memref<1x256x16xf32, #tpu.memory_space<vmem>>) attributes {dimension_semantics = [#tpu.dimension_semantics<parallel>, #tpu.dimension_semantics<parallel>], iteration_bounds = array<i64: 2, 1>, scalar_prefetch = 0 : i64, scratch_operands = 0 : i64, tpu.core_type = #tpu.core_type<tc>, window_params = [{transform_indices = @transform_0, window_bounds = array<i64: 1, 32, 256>}, {pipeline_mode = #tpu.pipeline_mode<synchronous>, transform_indices = @transform_1, window_bounds = array<i64: 32, 16>}, {pipeline_mode = #tpu.pipeline_mode<synchronous>, transform_indices = @transform_2, window_bounds = array<i64: 1, 16>}, {transform_indices = @transform_3, window_bounds = array<i64: 1, 256, 16>}]} {
    %c0 = arith.constant 0 : index
    %c0_0 = arith.constant 0 : index
    %0 = vector.load %arg3[%c0, %c0_0] : memref<32x16xf32, #tpu.memory_space<vmem>>, vector<32x16xf32>
    %c0_1 = arith.constant 0 : index
    %c0_2 = arith.constant 0 : index
    %1 = vector.load %arg4[%c0_1, %c0_2] : memref<1x16xf32, #tpu.memory_space<vmem>>, vector<1x16xf32>
    %c0_3 = arith.constant 0 : index
    %c0_4 = arith.constant 0 : index
    %c0_5 = arith.constant 0 : index
    %2 = vector.load %arg2[%c0_3, %c0_4, %c0_5] : memref<1x32x256xf32, #tpu.memory_space<vmem>>, vector<1x32x256xf32>
    %3 = vector.shape_cast %2 : vector<1x32x256xf32> to vector<32x256xf32>
    %cst = arith.constant dense<0.000000e+00> : vector<256x16xf32>
    %4 = tpu.matmul %3, %0, %cst {dimension_numbers = #tpu.dot_dimension_numbers<[0], [0], [1], [1], [0, 1, 1, 1], [], []>} : vector<32x256xf32>, vector<32x16xf32>, vector<256x16xf32> -> vector<256x16xf32>
    %5 = vector.broadcast %1 : vector<1x16xf32> to vector<256x16xf32>
    %6 = arith.addf %4, %5 : vector<256x16xf32>
    %c0_6 = arith.constant 0 : index
    %c0_7 = arith.constant 0 : index
    %c0_8 = arith.constant 0 : index
    %7 = vector.load %arg5[%c0_6, %c0_7, %c0_8] : memref<1x256x16xf32, #tpu.memory_space<vmem>>, vector<1x256x16xf32>
    %8 = vector.shape_cast %7 : vector<1x256x16xf32> to vector<256x16xf32>
    %9 = vector.shape_cast %6 : vector<256x16xf32> to vector<1x256x16xf32>
    tpu.vector_store %arg5[%c0_6, %c0_7, %c0_8], %9 {strides = array<i32>} : memref<1x256x16xf32, #tpu.memory_space<vmem>>, vector<1x256x16xf32>,
    return
  }
  func.func @transform_0(%arg0: i32, %arg1: i32) -> (i32, i32, i32) {
    %c0_i32 = arith.constant 0 : i32
    %c0_i32_0 = arith.constant 0 : i32
    return %arg0, %c0_i32, %arg1 : i32, i32, i32
  }
  func.func @transform_1(%arg0: i32, %arg1: i32) -> (i32, i32) {
    %c0_i32 = arith.constant 0 : i32
    %c0_i32_0 = arith.constant 0 : i32
    %c0_i32_1 = arith.constant 0 : i32
    return %c0_i32, %c0_i32_0 : i32, i32
  }
  func.func @transform_2(%arg0: i32, %arg1: i32) -> (i32, i32) {
    %c0_i32 = arith.constant 0 : i32
    %c0_i32_0 = arith.constant 0 : i32
    %c0_i32_1 = arith.constant 0 : i32
    return %c0_i32, %c0_i32_0 : i32, i32
  }
  func.func @transform_3(%arg0: i32, %arg1: i32) -> (i32, i32, i32) {
    %c0_i32 = arith.constant 0 : i32
    %c0_i32_0 = arith.constant 0 : i32
    return %arg0, %arg1, %c0_i32 : i32, i32, i32
  }
}

</mosaic_0001>

<bundles_post_ra>
// kernel: apply.1
= control target key start
LH: loop header
LB: loop body
LE: loop exit
PB: predicated region body
PF: predicated region fallthrough
CT: control target
= control target key end

     0   :  { %s954_s12 = smov 0   ;;  %s956_s13 = smov 0   ;;  %s1138_s0 = inlined_call_operand.vmem [shape: f32[2,32,256], index: 0, kind: input, shape index: {}]   ;;  %s1139_s1 = inlined_call_operand.vmem [shape: f32[32,16], index: 1, kind: input, shape index: {}]   ;;  %s1140_s2 = inlined_call_operand.vmem [shape: f32[1,16], index: 2, kind: input, shape index: {}]   ;;  %s1141_s3 = inlined_call_operand.vmem [shape: f32[2,256,16], index: 3, kind: output, shape index: {}]  }
   0x1   :  { %s958_s14 = smov 0  }
   0x2 LB: > { %s25_s15 = sadd.s32 1, %s928_s13  ;;  %p739_p0 = scmp.ge.s32.totalorder %s932_s14, 1  ;;  %s932_s14 = sphi %s958_s14, %s13_s14   ;;  %s928_s13 = sphi %s956_s13, %s1143_s13   ;;  %s924_s12 = sphi %s954_s12, %s1142_s12  }
   0x3   : > { %p27_p1 = scmp.ge.s32.totalorder %s25_s15, 2  ;;  %p158_p2 = scmp.lt.s32.totalorder %s932_s14, 3 }
   0x5   : > { %s1145_s15 = smov (%p27_p1, %s25_s15), 0  ;;  %p159_p3 = pnand %p739_p0, %p158_p2 }
   0x6   : > { %p191_p4 = scmp.lt.s32.totalorder (!%p159_p3), %s924_s12, 1  ;;  %v210_v0 = vld [vmem:[%s1139_s1] sm:$0xff] (!%p159_p3)  ;;  %v211_v1 = vld [vmem:[%s1139_s1 + $0x8] sm:$0xff] (!%p159_p3)  ;;  %v212_v3 = vld [vmem:[%s1139_s1 + $0x10] sm:$0xff] (!%p159_p3)  ;;  %vm293_vm0 = vcmask (!%p159_p3), 261120   ;;  %vm615_vm1 = vcmask (!%p159_p3), 130048  }
   0x7   : > { %162 = sbr.rel (%p159_p3) target bundleno = 423 (0x1a7), region = 32  ;;  %v873_v2 = vpack.c.bf16 (!%p159_p3), %v211_v1, %v210_v0  ;;  %v213_v4 = vld [vmem:[%s1139_s1 + $0x18] sm:$0xff] (!%p159_p3)  ;;  %v1026_v46 = vld [vmem:[%s1140_s2] ss:$0 sm:$0xff] (!%p159_p3) }
   0x8   : > { %v877_v7 = vpack.c.bf16 (!%p159_p3), %v213_v4, %v212_v3 }
   0x9   : > { %874 = vmatprep.subr.bf16.mxu0 (!%p159_p3), %v873_v2  ;;  %881 = vmatprep.subr.bf16.mxu1 (!%p159_p3), %v873_v2 }
   0xa   : > { %876 = vmatpush3.bf16.msra.mxu0 (!%p159_p3), %v873_v2  ;;  %883 = vmatpush3.bf16.msra.mxu1 (!%p159_p3), %v873_v2 }
   0xb   : > { %878 = vmatprep.subr.bf16.mxu0 (!%p159_p3), %v877_v7  ;;  %882 = vmatprep.subr.bf16.mxu1 (!%p159_p3), %v877_v7 }
   0xe   : > { %s1147_s12 = smov (!%p191_p4, %s924_s12), 1  ;;  %880 = vmatpush3.bf16.msra.mxu0 %v877_v7  ;;  %884 = vmatpush3.bf16.msra.mxu1 %v877_v7 }
   0xf   : > { %s779_s20 = sshll.u32 %s1147_s12, 6  ;;  %s780_s28 = sshll.u32 %s1147_s12, 8 }
  0x10   : > { %s198_s23 = scalar_lea.vmem %s1138_s0, %s779_s20  ;;  %s1031_s6 = scalar_lea.vmem %s1141_s3, %s780_s28 }
  0x11   : > { %v216_v5 = vld [vmem:[%s198_s23 + $0x8] sm:$0xff]  ;;  %v215_v6 = vld [vmem:[%s198_s23] sm:$0xff]  ;;  %v218_v8 = vld [vmem:[%s198_s23 + $0x18] sm:$0xff] }
  0x12   : > { %261 = vxpose.xlu1.b32.start [1/4] (short) %v216_v5, 128  ;;  %229 = vxpose.xlu0.b32.start [1/4] (short) %v215_v6, 128  ;;  %v217_v9 = vld [vmem:[%s198_s23 + $0x10] sm:$0xff]  ;;  %v220_v10 = vld [vmem:[%s198_s23 + $0x28] sm:$0xff]  ;;  %v219_v11 = vld [vmem:[%s198_s23 + $0x20] sm:$0xff] }
  0x13   : > { %v222_v12 = vld [vmem:[%s198_s23 + $0x38] sm:$0xff]  ;;  %v221_v13 = vld [vmem:[%s198_s23 + $0x30] sm:$0xff] }
  0x16   : > { %262 = vxpose.xlu1.b32.cont [2/4] (short) %v218_v8, 128  ;;  %230 = vxpose.xlu0.b32.cont [2/4] (short) %v217_v9, 128 }
  0x1a   : > { %263 = vxpose.xlu1.b32.cont [3/4] (short) %v220_v10, 128  ;;  %231 = vxpose.xlu0.b32.cont [3/4] (short) %v219_v11, 128 }
  0x1e   : > { %264 = vxpose.xlu1.b32.end [4/4] (short) %v222_v12, 128  ;;  %232 = vxpose.xlu0.b32.end [4/4] (short) %v221_v13, 128 }
  0x92   : > { %v277_v14 = vpop.trf.xlu1  ;;  %v245_v15 = vpop.trf.xlu0 }
  0x93   : > { %825 = vmatprep.mubr.msk.f32.mxu0 %vm293_vm0, %v245_v15  ;;  %849 = vmatprep.mubr.msk.f32.mxu1 %vm293_vm0, %v277_v14 }
  0x96   : > { %v278_v16 = vpop.trf.xlu1  ;;  %v246_v17 = vpop.trf.xlu0 }
  0x97   : > { %826 = vmatmul.mubr.msk.f32.vlgmr.msra.gmra.mrb[0].mxu0 %vm293_vm0, %v246_v17  ;;  %850 = vmatmul.mubr.msk.f32.vlgmr.msra.gmra.mrb[0].mxu1 %vm293_vm0, %v278_v16 }
  0x9a   : > { %v279_v18 = vpop.trf.xlu1  ;;  %v247_v19 = vpop.trf.xlu0 }
  0x9b   : > { %828 = vmatprep.mubr.msk.f32.mxu0 %vm293_vm0, %v247_v19  ;;  %852 = vmatprep.mubr.msk.f32.mxu1 %vm293_vm0, %v279_v18 }
  0x9e   : > { %v280_v20 = vpop.trf.xlu1  ;;  %v248_v21 = vpop.trf.xlu0 }
  0x9f   : > { %829 = vmatmul.mubr.msk.f32.gmra.mrb[2].mxu0 %vm293_vm0, %v248_v21  ;;  %853 = vmatmul.mubr.msk.f32.gmra.mrb[2].mxu1 %vm293_vm0, %v280_v20 }
  0xa2   : > { %v281_v22 = vpop.trf.xlu1  ;;  %v249_v23 = vpop.trf.xlu0 }
  0xa3   : > { %831 = vmatprep.mubr.msk.f32.mxu0 %vm293_vm0, %v249_v23  ;;  %855 = vmatprep.mubr.msk.f32.mxu1 %vm293_vm0, %v281_v22 }
  0xa6   : > { %v282_v24 = vpop.trf.xlu1  ;;  %v250_v25 = vpop.trf.xlu0 }
  0xa7   : > { %832 = vmatmul.mubr.msk.f32.gmra.mrb[4].mxu0 %vm293_vm0, %v250_v25  ;;  %856 = vmatmul.mubr.msk.f32.gmra.mrb[4].mxu1 %vm293_vm0, %v282_v24 }
  0xaa   : > { %v283_v26 = vpop.trf.xlu1  ;;  %v251_v27 = vpop.trf.xlu0 }
  0xab   : > { %834 = vmatprep.mubr.msk.f32.mxu0 %vm293_vm0, %v251_v27  ;;  %858 = vmatprep.mubr.msk.f32.mxu1 %vm293_vm0, %v283_v26 }
  0xae   : > { %v284_v28 = vpop.trf.xlu1  ;;  %v252_v29 = vpop.trf.xlu0 }
  0xaf   : > { %835 = vmatmul.mubr.msk.f32.gmra.mrb[6].mxu0 %vm293_vm0, %v252_v29  ;;  %859 = vmatmul.mubr.msk.f32.gmra.mrb[6].mxu1 %vm293_vm0, %v284_v28 }
  0xb2   : > { %v285_v30 = vpop.trf.xlu1  ;;  %v253_v31 = vpop.trf.xlu0 }
  0xb3   : > { %837 = vmatprep.mubr.msk.f32.mxu0 %vm293_vm0, %v253_v31  ;;  %861 = vmatprep.mubr.msk.f32.mxu1 %vm293_vm0, %v285_v30 }
  0xb6   : > { %v286_v32 = vpop.trf.xlu1  ;;  %v254_v33 = vpop.trf.xlu0 }
  0xb7   : > { %838 = vmatmul.mubr.msk.f32.gmra.mrb[8].mxu0 %vm293_vm0, %v254_v33  ;;  %862 = vmatmul.mubr.msk.f32.gmra.mrb[8].mxu1 %vm293_vm0, %v286_v32 }
  0xba   : > { %v287_v34 = vpop.trf.xlu1  ;;  %v255_v35 = vpop.trf.xlu0 }
  0xbb   : > { %840 = vmatprep.mubr.msk.f32.mxu0 %vm293_vm0, %v255_v35  ;;  %864 = vmatprep.mubr.msk.f32.mxu1 %vm293_vm0, %v287_v34 }
  0xbe   : > { %v288_v36 = vpop.trf.xlu1  ;;  %v256_v37 = vpop.trf.xlu0 }
  0xbf   : > { %841 = vmatmul.mubr.msk.f32.gmra.mrb[10].mxu0 %vm293_vm0, %v256_v37  ;;  %865 = vmatmul.mubr.msk.f32.gmra.mrb[10].mxu1 %vm293_vm0, %v288_v36 }
  0xc2   : > { %v289_v38 = vpop.trf.xlu1  ;;  %v257_v39 = vpop.trf.xlu0 }
  0xc3   : > { %843 = vmatprep.mubr.msk.f32.mxu0 %vm293_vm0, %v257_v39  ;;  %867 = vmatprep.mubr.msk.f32.mxu1 %vm293_vm0, %v289_v38 }
  0xc6   : > { %v290_v40 = vpop.trf.xlu1  ;;  %v258_v41 = vpop.trf.xlu0 }
  0xc7   : > { %844 = vmatmul.mubr.msk.f32.gmra.mrb[12].mxu0 %vm293_vm0, %v258_v41  ;;  %868 = vmatmul.mubr.msk.f32.gmra.mrb[12].mxu1 %vm293_vm0, %v290_v40 }
  0xca   : > { %v291_v42 = vpop.trf.xlu1  ;;  %v259_v43 = vpop.trf.xlu0 }
  0xcb   : > { %846 = vmatprep.mubr.msk.f32.mxu0 %vm293_vm0, %v259_v43  ;;  %870 = vmatprep.mubr.msk.f32.mxu1 %vm293_vm0, %v291_v42 }
  0xce   : > { %v292_v44 = vpop.trf.xlu1  ;;  %v260_v45 = vpop.trf.xlu0 }
  0xcf   : > { %847 = vmatmul.mubr.msk.f32.gmra.mrb[14].mxu0 %vm293_vm0, %v260_v45  ;;  %871 = vmatmul.mubr.msk.f32.gmra.mrb[14].mxu1 %vm293_vm0, %v292_v44 }
 0x16a   : > { %v827_v47 = vpop.f32.mrb[0].mxu0  ;;  %v851_v48 = vpop.f32.mrb[0].mxu1 }
 0x16b   : > { %v462_v49 = vadd.f32 %v827_v47, %v1026_v46  ;;  %v542_v50 = vadd.f32 %v851_v48, %v1026_v46  ;;  %v456_v51 = vpop.f32.mrb[1].mxu0  ;;  %v536_v52 = vpop.f32.mrb[1].mxu1 }
 0x16c   : > { %v457_v53 = vadd.f32 %v1026_v46, %v456_v51  ;;  %v537_v54 = vadd.f32 %v1026_v46, %v536_v52 }
 0x16d   : > { %617 = vst.msk [vmem:[%s1031_s6 + $0x8] sm:$0xff] %vm615_vm1, %v462_v49  ;;  %633 = vst.msk [vmem:[%s1031_s6 + $0x88] sm:$0xff] %vm615_vm1, %v542_v50 }
 0x16e   : > { %616 = vst.msk [vmem:[%s1031_s6] sm:$0xff] %vm615_vm1, %v457_v53  ;;  %632 = vst.msk [vmem:[%s1031_s6 + $0x80] sm:$0xff] %vm615_vm1, %v537_v54 }
 0x172   : > { %v830_v55 = vpop.f32.mrb[2].mxu0  ;;  %v854_v56 = vpop.f32.mrb[2].mxu1 }
 0x173   : > { %v472_v57 = vadd.f32 %v830_v55, %v1026_v46  ;;  %v552_v58 = vadd.f32 %v854_v56, %v1026_v46  ;;  %v466_v59 = vpop.f32.mrb[3].mxu0  ;;  %v546_v60 = vpop.f32.mrb[3].mxu1 }
 0x174   : > { %v467_v61 = vadd.f32 %v1026_v46, %v466_v59  ;;  %v547_v62 = vadd.f32 %v1026_v46, %v546_v60 }
 0x175   : > { %619 = vst.msk [vmem:[%s1031_s6 + $0x18] sm:$0xff] %vm615_vm1, %v472_v57  ;;  %635 = vst.msk [vmem:[%s1031_s6 + $0x98] sm:$0xff] %vm615_vm1, %v552_v58 }
 0x176   : > { %618 = vst.msk [vmem:[%s1031_s6 + $0x10] sm:$0xff] %vm615_vm1, %v467_v61  ;;  %634 = vst.msk [vmem:[%s1031_s6 + $0x90] sm:$0xff] %vm615_vm1, %v547_v62 }
 0x17a   : > { %v833_v63 = vpop.f32.mrb[4].mxu0  ;;  %v857_v0 = vpop.f32.mrb[4].mxu1 }
 0x17b   : > { %v482_v1 = vadd.f32 %v833_v63, %v1026_v46  ;;  %v562_v2 = vadd.f32 %v857_v0, %v1026_v46  ;;  %v476_v3 = vpop.f32.mrb[5].mxu0  ;;  %v556_v4 = vpop.f32.mrb[5].mxu1 }
 0x17c   : > { %v477_v5 = vadd.f32 %v1026_v46, %v476_v3  ;;  %v557_v6 = vadd.f32 %v1026_v46, %v556_v4 }
 0x17d   : > { %621 = vst.msk [vmem:[%s1031_s6 + $0x28] sm:$0xff] %vm615_vm1, %v482_v1  ;;  %637 = vst.msk [vmem:[%s1031_s6 + $0xa8] sm:$0xff] %vm615_vm1, %v562_v2 }
 0x17e   : > { %620 = vst.msk [vmem:[%s1031_s6 + $0x20] sm:$0xff] %vm615_vm1, %v477_v5  ;;  %636 = vst.msk [vmem:[%s1031_s6 + $0xa0] sm:$0xff] %vm615_vm1, %v557_v6 }
 0x182   : > { %v836_v7 = vpop.f32.mrb[6].mxu0  ;;  %v860_v8 = vpop.f32.mrb[6].mxu1 }
 0x183   : > { %v492_v9 = vadd.f32 %v836_v7, %v1026_v46  ;;  %v572_v10 = vadd.f32 %v860_v8, %v1026_v46  ;;  %v486_v11 = vpop.f32.mrb[7].mxu0  ;;  %v566_v12 = vpop.f32.mrb[7].mxu1 }
 0x184   : > { %v487_v13 = vadd.f32 %v1026_v46, %v486_v11  ;;  %v567_v14 = vadd.f32 %v1026_v46, %v566_v12 }
 0x185   : > { %623 = vst.msk [vmem:[%s1031_s6 + $0x38] sm:$0xff] %vm615_vm1, %v492_v9  ;;  %639 = vst.msk [vmem:[%s1031_s6 + $0xb8] sm:$0xff] %vm615_vm1, %v572_v10 }
 0x186   : > { %622 = vst.msk [vmem:[%s1031_s6 + $0x30] sm:$0xff] %vm615_vm1, %v487_v13  ;;  %638 = vst.msk [vmem:[%s1031_s6 + $0xb0] sm:$0xff] %vm615_vm1, %v567_v14 }
 0x18a   : > { %v839_v15 = vpop.f32.mrb[8].mxu0  ;;  %v863_v16 = vpop.f32.mrb[8].mxu1 }
 0x18b   : > { %v502_v17 = vadd.f32 %v839_v15, %v1026_v46  ;;  %v582_v18 = vadd.f32 %v863_v16, %v1026_v46  ;;  %v496_v19 = vpop.f32.mrb[9].mxu0  ;;  %v576_v20 = vpop.f32.mrb[9].mxu1 }
 0x18c   : > { %v497_v21 = vadd.f32 %v1026_v46, %v496_v19  ;;  %v577_v22 = vadd.f32 %v1026_v46, %v576_v20 }
 0x18d   : > { %625 = vst.msk [vmem:[%s1031_s6 + $0x48] sm:$0xff] %vm615_vm1, %v502_v17  ;;  %641 = vst.msk [vmem:[%s1031_s6 + $0xc8] sm:$0xff] %vm615_vm1, %v582_v18 }
 0x18e   : > { %624 = vst.msk [vmem:[%s1031_s6 + $0x40] sm:$0xff] %vm615_vm1, %v497_v21  ;;  %640 = vst.msk [vmem:[%s1031_s6 + $0xc0] sm:$0xff] %vm615_vm1, %v577_v22 }
 0x192   : > { %v842_v23 = vpop.f32.mrb[10].mxu0  ;;  %v866_v24 = vpop.f32.mrb[10].mxu1 }
 0x193   : > { %v512_v25 = vadd.f32 %v842_v23, %v1026_v46  ;;  %v592_v26 = vadd.f32 %v866_v24, %v1026_v46  ;;  %v506_v27 = vpop.f32.mrb[11].mxu0  ;;  %v586_v28 = vpop.f32.mrb[11].mxu1 }
 0x194   : > { %v507_v29 = vadd.f32 %v1026_v46, %v506_v27  ;;  %v587_v30 = vadd.f32 %v1026_v46, %v586_v28 }
 0x195   : > { %627 = vst.msk [vmem:[%s1031_s6 + $0x58] sm:$0xff] %vm615_vm1, %v512_v25  ;;  %643 = vst.msk [vmem:[%s1031_s6 + $0xd8] sm:$0xff] %vm615_vm1, %v592_v26 }
 0x196   : > { %626 = vst.msk [vmem:[%s1031_s6 + $0x50] sm:$0xff] %vm615_vm1, %v507_v29  ;;  %642 = vst.msk [vmem:[%s1031_s6 + $0xd0] sm:$0xff] %vm615_vm1, %v587_v30 }
 0x19a   : > { %v845_v31 = vpop.f32.mrb[12].mxu0  ;;  %v869_v32 = vpop.f32.mrb[12].mxu1 }
 0x19b   : > { %v522_v33 = vadd.f32 %v845_v31, %v1026_v46  ;;  %v602_v34 = vadd.f32 %v869_v32, %v1026_v46  ;;  %v516_v35 = vpop.f32.mrb[13].mxu0  ;;  %v596_v36 = vpop.f32.mrb[13].mxu1 }
 0x19c   : > { %v517_v37 = vadd.f32 %v1026_v46, %v516_v35  ;;  %v597_v38 = vadd.f32 %v1026_v46, %v596_v36 }
 0x19d   : > { %629 = vst.msk [vmem:[%s1031_s6 + $0x68] sm:$0xff] %vm615_vm1, %v522_v33  ;;  %645 = vst.msk [vmem:[%s1031_s6 + $0xe8] sm:$0xff] %vm615_vm1, %v602_v34 }
 0x19e   : > { %628 = vst.msk [vmem:[%s1031_s6 + $0x60] sm:$0xff] %vm615_vm1, %v517_v37  ;;  %644 = vst.msk [vmem:[%s1031_s6 + $0xe0] sm:$0xff] %vm615_vm1, %v597_v38 }
 0x1a2   : > { %v848_v39 = vpop.f32.mrb[14].mxu0  ;;  %v872_v40 = vpop.f32.mrb[14].mxu1 }
 0x1a3   : > { %v532_v41 = vadd.f32 %v848_v39, %v1026_v46  ;;  %v612_v42 = vadd.f32 %v872_v40, %v1026_v46  ;;  %v526_v43 = vpop.f32.mrb[15].mxu0  ;;  %v606_v44 = vpop.f32.mrb[15].mxu1 }
 0x1a4   : > { %v527_v45 = vadd.f32 %v1026_v46, %v526_v43  ;;  %v607_v47 = vadd.f32 %v1026_v46, %v606_v44 }
 0x1a5   : > { %631 = vst.msk [vmem:[%s1031_s6 + $0x78] sm:$0xff] %vm615_vm1, %v532_v41  ;;  %647 = vst.msk [vmem:[%s1031_s6 + $0xf8] sm:$0xff] %vm615_vm1, %v612_v42 }
 0x1a6   : > { %630 = vst.msk [vmem:[%s1031_s6 + $0x70] sm:$0xff] %vm615_vm1, %v527_v45  ;;  %646 = vst.msk [vmem:[%s1031_s6 + $0xf0] sm:$0xff] %vm615_vm1, %v607_v47 }
 0x1a7 PF: > { %s13_s14 = sadd.s32 1, %s932_s14   ;;  %s1142_s12 = smov %s928_s13 }
 0x1a8   : > { %p10_p5 = scmp.ge.s32.totalorder %s13_s14, 4   ;;  %s1143_s13 = smov %s1145_s15 }
 0x1aa   :  { %12 = sbr.rel (!%p10_p5) target bundleno = 2 (0x2), region = 62 }

</bundles_post_ra>
